<compile_context>
chip_gen: v5e
topology: v5e:2x2
jax: 0.10.0
libtpu: 0.0.40
codegen_flags: <defaults>
</compile_context>

<pallas_src>
import math

import jax
import jax.numpy as jnp
from jax.experimental import pallas as pl
from jax.experimental.pallas import tpu as pltpu


def make_pe_table(embed_dim, max_len=5000, dtype=jnp.float32):
    """Deterministic sinusoidal positional-encoding buffer, shape (max_len, D)."""
    assert embed_dim % 2 == 0
    pos = jnp.arange(max_len, dtype=jnp.float32)[:, None]            # (max_len, 1)
    i = jnp.arange(0, embed_dim, 2, dtype=jnp.float32)[None, :]      # (1, D/2)
    angle = pos * jnp.exp(-i * (math.log(10000.0) / embed_dim))      # (max_len, D/2)
    pe = jnp.zeros((max_len, embed_dim), dtype=jnp.float32)
    pe = pe.at[:, 0::2].set(jnp.sin(angle))
    pe = pe.at[:, 1::2].set(jnp.cos(angle))
    return pe.astype(dtype)


# --------------------------------------------------------------------------- #
# Kernels
# --------------------------------------------------------------------------- #
def _add_pe_kernel(x_ref, pe_ref, o_ref):
    # x_ref: (tn, tc) tile of flattened (N, S*D) input; pe_ref: (1, tc) tile
    # broadcast over the row tile.
    o_ref[...] = (x_ref[...] + pe_ref[...]).astype(o_ref.dtype)


def _add_pe_dropout_kernel(x_ref, pe_ref, mask_ref, o_ref):
    # mask_ref holds the pre-scaled inverted-dropout mask: {0, 1/(1-p)}.
    o_ref[...] = ((x_ref[...] + pe_ref[...]) * mask_ref[...]).astype(o_ref.dtype)


# --------------------------------------------------------------------------- #
# Tile selection
# --------------------------------------------------------------------------- #
def _choose_tiles(N, C, itemsize):
    LANE = 128
    sub = 8 * max(1, 4 // itemsize)        # sublane rounding per dtype packing
    MAX_TC = 8192                          # lane-tile cap (multiple of 128)
    TARGET_BYTES = 4 << 20                 # ~4 MiB per x tile, dtype-aware

    tc = C if C <= MAX_TC else MAX_TC      # full extent or a 128-multiple
    tn = max(1, TARGET_BYTES // (tc * itemsize))
    if tn >= N:
        tn = N                             # full extent on the row axis
    else:
        tn = max(sub, (tn // sub) * sub)   # packing-aligned when tiling rows
        tn = min(tn, N)

    # v7x megacore guard: give a non-trivial input >= 2 grid steps so both
    # TensorCores get work.
    if N * C * itemsize >= (1 << 20) and pl.cdiv(N, tn) * pl.cdiv(C, tc) == 1:
        if tn >= 2 * sub:
            tn = max(sub, (((tn + 1) // 2) // sub) * sub)
        elif tc >= 2 * LANE:
            tc = max(LANE, (((tc + 1) // 2) // LANE) * LANE)
    return tn, tc


# --------------------------------------------------------------------------- #
# pe-slice cache (hoists slice + cast + flatten across calls for fixed S/dtype)
# --------------------------------------------------------------------------- #
_PE_CACHE = {}


def _get_pe_flat(pe_table, S, dtype):
    key = (id(pe_table), int(S), jnp.dtype(dtype).name)
    hit = _PE_CACHE.get(key)
    if hit is not None and hit[0] is pe_table:   # identity check guards id reuse
        return hit[1]
    D = pe_table.shape[-1]
    pe_flat = pe_table[:S, :].astype(dtype).reshape(1, S * D)
    _PE_CACHE[key] = (pe_table, pe_flat)
    return pe_flat


# --------------------------------------------------------------------------- #
# Wrapper
# --------------------------------------------------------------------------- #
def positional_encoding(x, pe_table, *, dropout_p=0.1, training=False, seed=0,
                        donate_x=False):
    """x: (N, S, D) float array. Returns dropout(x + pe[:S])."""
    N, S, D = x.shape
    C = S * D
    dtype = x.dtype
    itemsize = jnp.dtype(dtype).itemsize

    p = float(min(max(dropout_p, 0.0), 1.0))
    use_dropout = training and p > 0.0
    if use_dropout and p >= 1.0:
        return jnp.zeros_like(x)           # everything dropped

    pe_flat = _get_pe_flat(pe_table, S, dtype)
    x_flat = x.reshape(N, C)

    tn, tc = _choose_tiles(N, C, itemsize)
    # Column tiles outermost, row tiles innermost: the pe block index (0, j)
    # is constant across the inner loop, so pe is fetched once per column tile.
    grid = (pl.cdiv(C, tc), pl.cdiv(N, tn))

    in_specs = [
        pl.BlockSpec((tn, tc), lambda j, i: (i, j)),     # x
        pl.BlockSpec((1, tc), lambda j, i: (0, j)),      # pe (broadcast over rows)
    ]
    operands = [x_flat, pe_flat]

    if use_dropout:
        keep = jax.random.bernoulli(jax.random.PRNGKey(seed), 1.0 - p, (N, C))
        scale = jnp.asarray(1.0 / (1.0 - p), dtype)
        mask = keep.astype(dtype) * scale                # {0, 1/(1-p)} in x.dtype
        in_specs.append(pl.BlockSpec((tn, tc), lambda j, i: (i, j)))
        operands.append(mask)
        kernel = _add_pe_dropout_kernel
    else:
        kernel = _add_pe_kernel

    out_flat = pl.pallas_call(
        kernel,
        out_shape=jax.ShapeDtypeStruct((N, C), dtype),
        grid=grid,
        in_specs=in_specs,
        out_specs=pl.BlockSpec((tn, tc), lambda j, i: (i, j)),
        compiler_params=pltpu.CompilerParams(
            dimension_semantics=("parallel", "parallel"),
            vmem_limit_bytes=48 * 1024 * 1024),
        # Alias x to the output when the caller donates it (allocator win only).
        input_output_aliases=({0: 0} if donate_x else {}),
    )(*operands)

    return out_flat.reshape(N, S, D)


# --------------------------------------------------------------------------- #
# Self-test
# --------------------------------------------------------------------------- #
if __name__ == "__main__":
    max_len = 5000
    key = jax.random.PRNGKey(0)

    # --- case 1: small shape from the module docstring (eval mode, exact) ----
    N, S, D = 2, 8, 32
    x = jax.random.normal(key, (N, S, D), dtype=jnp.float32)
    pe_table = make_pe_table(D, max_len=max_len)

    out = positional_encoding(x, pe_table, dropout_p=0.1, training=False)
    out = jax.block_until_ready(out)
    ref = x + pe_table[:S, :][None, :, :]
    assert out.shape == (N, S, D)
    assert jnp.allclose(out, ref, atol=1e-6, rtol=1e-6), "eval mismatch (small)"

    # --- case 2: shape that exercises column tiling (C = 16384 > 8192) -------
    N2, S2, D2 = 4, 128, 128
    x2 = jax.random.normal(jax.random.PRNGKey(0), (N2, S2, D2), dtype=jnp.float32)
    pe_table2 = make_pe_table(D2, max_len=max_len)
    out2 = positional_encoding(x2, pe_table2, dropout_p=0.1, training=False)
    out2 = jax.block_until_ready(out2)
    ref2 = x2 + pe_table2[:S2, :][None, :, :]
    assert out2.shape == (N2, S2, D2)
    assert jnp.allclose(out2, ref2, atol=1e-6, rtol=1e-6), "eval mismatch (tiled)"

    # --- case 3: training mode (dropout path) ---------------------------------
    p = 0.5
    out_tr = positional_encoding(x, pe_table, dropout_p=p, training=True, seed=123)
    out_tr = jax.block_until_ready(out_tr)
    assert out_tr.shape == (N, S, D)
    assert bool(jnp.all(jnp.isfinite(out_tr)))
    # Non-dropped elements must equal (x + pe) / (1 - p); dropped ones are 0.
    elem_ok = jnp.isclose(out_tr, ref / (1.0 - p), atol=1e-5) | (out_tr == 0.0)
    assert bool(jnp.all(elem_ok)), "training-mode values inconsistent"
    drop_frac = float(jnp.mean((out_tr == 0.0).astype(jnp.float32)))
    assert 0.2 < drop_frac < 0.8, f"implausible dropout fraction {drop_frac}"

    print("KERNEL_OK")
</pallas_src>

<mosaic_0001>
module attributes {stable_mosaic.version = 11 : i64} {
  func.func @_add_pe_kernel(%arg0: i32, %arg1: i32, %arg2: memref<2x256xf32, #tpu.memory_space<vmem>>, %arg3: memref<1x256xf32, #tpu.memory_space<vmem>>, %arg4: memref<2x256xf32, #tpu.memory_space<vmem>>) attributes {dimension_semantics = [#tpu.dimension_semantics<parallel>, #tpu.dimension_semantics<parallel>], iteration_bounds = array<i64: 1, 1>, scalar_prefetch = 0 : i64, scratch_operands = 0 : i64, tpu.core_type = #tpu.core_type<tc>, window_params = [{transform_indices = @transform_0, window_bounds = array<i64: 2, 256>}, {transform_indices = @transform_1, window_bounds = array<i64: 1, 256>}, {transform_indices = @transform_2, window_bounds = array<i64: 2, 256>}]} {
    %c0 = arith.constant 0 : index
    %c0_0 = arith.constant 0 : index
    %0 = vector.load %arg2[%c0, %c0_0] : memref<2x256xf32, #tpu.memory_space<vmem>>, vector<2x256xf32>
    %c0_1 = arith.constant 0 : index
    %c0_2 = arith.constant 0 : index
    %1 = vector.load %arg3[%c0_1, %c0_2] : memref<1x256xf32, #tpu.memory_space<vmem>>, vector<1x256xf32>
    %2 = vector.broadcast %1 : vector<1x256xf32> to vector<2x256xf32>
    %3 = arith.addf %0, %2 : vector<2x256xf32>
    %c0_3 = arith.constant 0 : index
    %c0_4 = arith.constant 0 : index
    %4 = vector.load %arg4[%c0_3, %c0_4] : memref<2x256xf32, #tpu.memory_space<vmem>>, vector<2x256xf32>
    tpu.vector_store %arg4[%c0_3, %c0_4], %3 {strides = array<i32>} : memref<2x256xf32, #tpu.memory_space<vmem>>, vector<2x256xf32>,
    return
  }
  func.func @transform_0(%arg0: i32, %arg1: i32) -> (i32, i32) {
    %c0_i32 = arith.constant 0 : i32
    return %arg1, %arg0 : i32, i32
  }
  func.func @transform_1(%arg0: i32, %arg1: i32) -> (i32, i32) {
    %c0_i32 = arith.constant 0 : i32
    %c0_i32_0 = arith.constant 0 : i32
    return %c0_i32, %arg0 : i32, i32
  }
  func.func @transform_2(%arg0: i32, %arg1: i32) -> (i32, i32) {
    %c0_i32 = arith.constant 0 : i32
    return %arg1, %arg0 : i32, i32
  }
}

</mosaic_0001>

<bundles_post_ra>
// kernel: tpu_custom_call.1
= control target key start
LH: loop header
LB: loop body
LE: loop exit
PB: predicated region body
PF: predicated region fallthrough
CT: control target
= control target key end

     0   :  { %7 = vsyncpa [#allocation3], 0  ;;  %s177_s0 = inlined_call_operand.hbm [shape: f32[2,256], index: 0, kind: input, shape index: {}]   ;;  %s178_s1 = inlined_call_operand.hbm [shape: f32[1,256], index: 1, kind: input, shape index: {}]   ;;  %s179_s2 = inlined_call_operand.hbm [shape: f32[2,256], index: 2, kind: output, shape index: {}]  }
   0x1   :  { %8 = vsyncpa [#allocation6], 0 }
   0x2   :  { %9 = vsyncpa [#allocation4], 0  ;;  %s15_s11 = sshll.u32 %s177_s0, 4  ;;  %s150_s12 = smov [#allocation2]   ;;  %s16_s11 = int_to_ptr.hbm [resolvable:$true] %s15_s11 }
   0x3   :  { %s17_s13 = sshll.u32 %s150_s12, 4  ;;  %s26_s16 = sshll.u32 %s178_s1, 4  ;;  %s18_s13 = int_to_ptr.vmem [resolvable:$true] %s17_s13  ;;  %s27_s16 = int_to_ptr.hbm [resolvable:$true] %s26_s16 }
   0x4   :  { %20 = dma.hbm_to_vmem [thread:$0]  %s16_s11, 64, %s18_s13, [#allocation3]  }
   0x5   :  { %s151_s17 = smov [#allocation5]  }
   0x6   :  { %s28_s18 = sshll.u32 %s151_s17, 4  ;;  %s29_s18 = int_to_ptr.vmem [resolvable:$true] %s28_s18 }
   0x7   :  { %31 = dma.hbm_to_vmem [thread:$0]  %s27_s16, 32, %s29_s18, [#allocation6]  }
   0x8   :  { %144 = dma.done.wait [#allocation3], 64  }
   0x9   :  { %145 = vsyncadd [#allocation3], 4294967232 }
   0xa   :  { %146 = dma.done.wait [#allocation6], 32  }
   0xb   :  { %147 = vsyncadd [#allocation6], 4294967264  ;;  %v41_v0 = vld [vmem:[#allocation5] sm:$0x3]  ;;  %vm46_vm0 = vcmask 1041408   ;;  %s152_s0 = smov [#allocation7]  }
   0xc   :  { %v43_v1 = vperm.slane %v41_v0, 0  ;;  %v44_v2 = vperm.slane %v41_v0, 1  ;;  %v40_v3 = vld [vmem:[#allocation2] sm:$0xf]  ;;  %s56_s19 = sshll.u32 %s152_s0, 4  ;;  %s58_s21 = sshll.u32 %s179_s2, 4  ;;  %s57_s19 = int_to_ptr.vmem [resolvable:$true] %s56_s19  ;;  %s59_s21 = int_to_ptr.hbm [resolvable:$true] %s58_s21 }
   0xe   :  { %v45_v4 = vrot.slane %v44_v2, 6 }
  0x10   :  { %v47_v5 = vsel %vm46_vm0, %v43_v1, %v45_v4 }
  0x11   :  { %v49_v6 = vadd.f32 %v47_v5, %v40_v3 }
  0x13   :  { %50 = vst [vmem:[#allocation7] sm:$0xf] %v49_v6 }
  0x14   :  { %61 = dma.vmem_to_hbm [thread:$0]  %s57_s19, 64, %s59_s21, [#allocation4]  }
  0x15   :  { %148 = dma.done.wait [#allocation4], 64  }
  0x16   :  { %149 = vsyncadd [#allocation4], 4294967232 }
  0x17   :  { %66 = vsyncpa [#allocation3], 1 }
  0x18   :  { %67 = vsyncpa [#allocation6], 1 }
  0x19   :  { %68 = vsyncpa [#allocation4], 1 }

</bundles_post_ra>
